<compile_context>
chip_gen: v7x
topology: tpu7x:2x2x1
jax: 0.10.0
libtpu: 0.0.40
codegen_flags: <defaults>
</compile_context>

<pallas_src>
import functools

import jax
import jax.numpy as jnp
from jax.experimental import pallas as pl
from jax.experimental.pallas import tpu as pltpu

MARGIN = 0.5
EPS = 1e-6                              # torch F.pairwise_distance default eps


def _round_up(x, m):
    return ((x + m - 1) // m) * m


def _num_tensorcores():
    """2 TensorCores/chip on megacore parts (v4 / v5p / v7x), else 1."""
    try:
        kind = jax.devices()[0].device_kind.lower()
    except Exception:
        return 1
    if ("v7" in kind) or ("v4" in kind) or ("v5p" in kind):
        return 2
    return 1


def _physical_vmem_bytes():
    try:
        info = pltpu.get_tpu_info()
        cap = int(getattr(info, "vmem_capacity_bytes", 0))
        if cap > 0:
            return cap
    except Exception:
        pass
    return 64 * 1024 * 1024             # conservative (v7x-sized) fallback


def _contrastive_loss_kernel(o1_ref, o2_ref, label_ref, out_ref, acc_ref, *,
                             tile_n, tiles_per_core, n_total, margin):
    t = pl.program_id(1)

    @pl.when(t == 0)
    def _init():
        acc_ref[...] = jnp.zeros_like(acc_ref)

    # Unclamped global row offset of this tile (masking only; out-of-range tiles
    # were clamped by the index_map to re-read an in-bounds block).
    tile_idx = pl.program_id(0) * tiles_per_core + t
    row_start = tile_idx * tile_n

    # Native-dtype blocks on the wire; all math in f32 (mandatory on v5e).
    o1 = o1_ref[...].astype(jnp.float32)                        # (tile_n, D)
    o2 = o2_ref[...].astype(jnp.float32)
    lbl = label_ref[...]                                        # (tile_n, 1)

    diff = o1 - o2 + EPS
    sq_dist = jnp.sum(diff * diff, axis=-1, keepdims=True)      # dist^2, (tile_n, 1)
    dist = jnp.sqrt(sq_dist)
    loss = 0.5 * (lbl * sq_dist
                  + (1.0 - lbl) * jnp.square(jnp.maximum(margin - dist, 0.0)))

    is_full = row_start + tile_n <= n_total

    @pl.when(is_full)
    def _accumulate_full():
        acc_ref[...] += jnp.sum(loss, keepdims=True)            # (1, 1) f32

    @pl.when(jnp.logical_not(is_full))
    def _accumulate_ragged():
        # Only ragged last tiles / clamped duplicate tiles pay for the mask.
        rows = row_start + jax.lax.broadcasted_iota(jnp.int32, loss.shape, 0)
        acc_ref[...] += jnp.sum(jnp.where(rows < n_total, loss, 0.0),
                                keepdims=True)

    @pl.when(t == pl.num_programs(1) - 1)
    def _finalize():
        # Per-core partial mean; the wrapper sums the (<= 2) core partials.
        out_ref[...] = jnp.broadcast_to(
            (acc_ref[...] * (1.0 / n_total)).reshape(1, 1, 1), out_ref.shape)


def contrastive_loss(output1, output2, label, *, margin=MARGIN, tile_n=None):
    """output1, output2: [N, D] floats (any float dtype); label: [N] 0/1. Returns f32 scalar."""
    n, d = output1.shape
    assert output2.shape == (n, d)
    itemsize = jnp.dtype(output1.dtype).itemsize

    # Generation-aware scoped-VMEM limit: 3/4 of physical, capped at 64 MiB
    # (=> 64 MiB on v5e/v6e with 128 MiB physical, 48 MiB on v7x with 64 MiB).
    physical_vmem = _physical_vmem_bytes()
    vmem_limit = min(64 * 1024 * 1024, (physical_vmem * 3) // 4)
    block_budget = (vmem_limit * 3) // 4        # headroom for outputs/bookkeeping

    # Dtype-aware per-row VMEM cost:
    #   2 inputs x 2 pipeline buffers at native dtype
    # + 2 buffers of the lane-padded (tile_n, 1) f32 label block (512 B/row)
    # + ~2 f32 temporaries for the upcast/diff/square chain.
    per_row_bytes = 4 * d * itemsize + 2 * 512 + 2 * d * 4

    if tile_n is None:
        tile_n = block_budget // per_row_bytes
    tile_n = max(128, (int(tile_n) // 128) * 128)      # multiple of 128
    tile_n = min(tile_n, _round_up(n, 128))

    num_tiles = -(-n // tile_n)
    num_cores = _num_tensorcores()
    if num_tiles < num_cores:
        num_cores = 1
    tiles_per_core = -(-num_tiles // num_cores)
    last_tile = num_tiles - 1

    # Labels are tiny (4 B/row): padding + reshaping them in the wrapper is
    # cheap, unlike the data arrays which stream untouched at native dtype.
    rows_padded = num_tiles * tile_n
    label_col = jnp.pad(label.reshape(n).astype(jnp.float32),
                        (0, rows_padded - n)).reshape(rows_padded, 1)

    def data_map(c, t):
        # Clamp so out-of-range duplicate tiles re-read an in-bounds block
        # (their rows are masked in-kernel and contribute zero).
        return (jnp.minimum(c * tiles_per_core + t, last_tile), 0)

    kernel = functools.partial(
        _contrastive_loss_kernel,
        tile_n=tile_n, tiles_per_core=tiles_per_core, n_total=n, margin=margin)

    partials = pl.pallas_call(
        kernel,
        out_shape=jax.ShapeDtypeStruct((num_cores, 8, 128), jnp.float32),
        grid_spec=pltpu.PrefetchScalarGridSpec(
            num_scalar_prefetch=0,
            grid=(num_cores, tiles_per_core),
            in_specs=[
                pl.BlockSpec((tile_n, d), data_map),     # output1 tile
                pl.BlockSpec((tile_n, d), data_map),     # output2 tile
                pl.BlockSpec((tile_n, 1), data_map),     # per-tile label block
            ],
            out_specs=pl.BlockSpec((1, 8, 128), lambda c, t: (c, 0, 0)),
            scratch_shapes=[pltpu.VMEM((1, 1), jnp.float32)],
        ),
        compiler_params=pltpu.CompilerParams(
            dimension_semantics=("parallel", "arbitrary"),
            vmem_limit_bytes=vmem_limit,
        ),
    )(output1, output2, label_col)

    # Each core wrote its partial mean contribution; combine them.
    return jnp.sum(partials[:, 0, 0])


def _reference(output1, output2, label, margin=MARGIN):
    o1 = output1.astype(jnp.float32)
    o2 = output2.astype(jnp.float32)
    diff = o1 - o2 + EPS
    dist = jnp.sqrt(jnp.sum(diff * diff, axis=-1))
    loss = 0.5 * (label * dist ** 2
                  + (1.0 - label) * jnp.maximum(margin - dist, 0.0) ** 2)
    return jnp.mean(loss)


if __name__ == "__main__":
    key = jax.random.PRNGKey(0)
    k1, k2, k3, k4, k5, k6 = jax.random.split(key, 6)

    # Test 1: small f32 problem (single tile, single core-split, block > batch).
    n1, d1 = 8, 32
    o1 = jax.random.normal(k1, (n1, d1), dtype=jnp.float32)
    o2 = jax.random.normal(k2, (n1, d1), dtype=jnp.float32)
    lbl1 = jax.random.bernoulli(k3, 0.5, (n1,)).astype(jnp.float32)
    got1 = jax.block_until_ready(contrastive_loss(o1, o2, lbl1))
    ref1 = _reference(o1, o2, lbl1)
    assert jnp.allclose(got1, ref1, atol=1e-5, rtol=1e-5), (got1, ref1)

    # Test 2: bf16 inputs (native-dtype DMA path), ragged batch, multi-tile grid;
    # forced small 128-row tile exercises masking + accumulation (+ the 2-way
    # core split with a clamped duplicate tile when running on a megacore chip).
    n2, d2 = 300, 128
    o1b = jax.random.normal(k4, (n2, d2), dtype=jnp.float32).astype(jnp.bfloat16)
    o2b = jax.random.normal(k5, (n2, d2), dtype=jnp.float32).astype(jnp.bfloat16)
    lbl2 = jax.random.bernoulli(k6, 0.5, (n2,)).astype(jnp.float32)
    got2 = jax.block_until_ready(contrastive_loss(o1b, o2b, lbl2, tile_n=128))
    ref2 = _reference(o1b, o2b, lbl2)
    assert jnp.allclose(got2, ref2, atol=1e-4, rtol=1e-4), (got2, ref2)

    print("KERNEL_OK")
</pallas_src>

<mosaic_0001>
module attributes {stable_mosaic.version = 11 : i64} {
  func.func @_contrastive_loss_kernel(%arg0: i32, %arg1: i32, %arg2: memref<128x32xf32, #tpu.memory_space<vmem>>, %arg3: memref<128x32xf32, #tpu.memory_space<vmem>>, %arg4: memref<128x1xf32, #tpu.memory_space<vmem>>, %arg5: memref<1x8x128xf32, #tpu.memory_space<vmem>>, %arg6: memref<1x1xf32, #tpu.memory_space<vmem>>) attributes {dimension_semantics = [#tpu.dimension_semantics<parallel>, #tpu.dimension_semantics<arbitrary>], iteration_bounds = array<i64: 1, 1>, scalar_prefetch = 0 : i64, scratch_operands = 1 : i64, tpu.core_type = #tpu.core_type<tc>, window_params = [{transform_indices = @transform_0, window_bounds = array<i64: 128, 32>}, {transform_indices = @transform_1, window_bounds = array<i64: 128, 32>}, {transform_indices = @transform_2, window_bounds = array<i64: 128, 1>}, {transform_indices = @transform_3, window_bounds = array<i64: 1, 8, 128>}]} {
    %c0_i32 = arith.constant 0 : i32
    %0 = arith.cmpi eq, %arg1, %c0_i32 : i32
    %1 = arith.extui %0 : i1 to i32
    %c0_i32_0 = arith.constant 0 : i32
    %2 = arith.cmpi ne, %1, %c0_i32_0 : i32
    scf.if %2 {
      %cst_16 = arith.constant 0.000000e+00 : f32
      %38 = vector.broadcast %cst_16 : f32 to vector<1x1xf32>
      %c0_17 = arith.constant 0 : index
      %c0_18 = arith.constant 0 : index
      %39 = vector.load %arg6[%c0_17, %c0_18] : memref<1x1xf32, #tpu.memory_space<vmem>>, vector<1x1xf32>
      tpu.vector_store %arg6[%c0_17, %c0_18], %38 {strides = array<i32>} : memref<1x1xf32, #tpu.memory_space<vmem>>, vector<1x1xf32>,
    } else {
    }
    %c1_i32 = arith.constant 1 : i32
    %3 = arith.muli %arg0, %c1_i32 : i32
    %4 = arith.addi %3, %arg1 : i32
    %c128_i32 = arith.constant 128 : i32
    %5 = arith.muli %4, %c128_i32 : i32
    %c0 = arith.constant 0 : index
    %c0_1 = arith.constant 0 : index
    %6 = vector.load %arg2[%c0, %c0_1] : memref<128x32xf32, #tpu.memory_space<vmem>>, vector<128x32xf32>
    %c0_2 = arith.constant 0 : index
    %c0_3 = arith.constant 0 : index
    %7 = vector.load %arg3[%c0_2, %c0_3] : memref<128x32xf32, #tpu.memory_space<vmem>>, vector<128x32xf32>
    %c0_4 = arith.constant 0 : index
    %c0_5 = arith.constant 0 : index
    %8 = vector.load %arg4[%c0_4, %c0_5] : memref<128x1xf32, #tpu.memory_space<vmem>>, vector<128x1xf32>
    %9 = arith.subf %6, %7 : vector<128x32xf32>
    %cst = arith.constant 9.99999997E-7 : f32
    %10 = vector.broadcast %cst : f32 to vector<128x32xf32>
    %11 = arith.addf %9, %10 : vector<128x32xf32>
    %12 = arith.mulf %11, %11 : vector<128x32xf32>
    %cst_6 = arith.constant dense<0.000000e+00> : vector<128xf32>
    %13 = vector.multi_reduction <add>, %12, %cst_6 [1] : vector<128x32xf32> to vector<128xf32>
    %14 = vector.shape_cast %13 : vector<128xf32> to vector<128x1xf32>
    %15 = math.sqrt %14 : vector<128x1xf32>
    %16 = arith.mulf %8, %14 : vector<128x1xf32>
    %cst_7 = arith.constant 1.000000e+00 : f32
    %17 = vector.broadcast %cst_7 : f32 to vector<128x1xf32>
    %18 = arith.subf %17, %8 : vector<128x1xf32>
    %cst_8 = arith.constant 5.000000e-01 : f32
    %19 = vector.broadcast %cst_8 : f32 to vector<128x1xf32>
    %20 = arith.subf %19, %15 : vector<128x1xf32>
    %cst_9 = arith.constant 0.000000e+00 : f32
    %21 = vector.broadcast %cst_9 : f32 to vector<128x1xf32>
    %22 = arith.maximumf %20, %21 : vector<128x1xf32>
    %23 = arith.mulf %22, %22 : vector<128x1xf32>
    %24 = arith.mulf %18, %23 : vector<128x1xf32>
    %25 = arith.addf %16, %24 : vector<128x1xf32>
    %cst_10 = arith.constant 5.000000e-01 : f32
    %26 = vector.broadcast %cst_10 : f32 to vector<128x1xf32>
    %27 = arith.mulf %26, %25 : vector<128x1xf32>
    %c128_i32_11 = arith.constant 128 : i32
    %28 = arith.addi %5, %c128_i32_11 : i32
    %c8_i32 = arith.constant 8 : i32
    %29 = arith.cmpi sle, %28, %c8_i32 : i32
    %30 = arith.extui %29 : i1 to i32
    %c0_i32_12 = arith.constant 0 : i32
    %31 = arith.cmpi ne, %30, %c0_i32_12 : i32
    scf.if %31 {
      %c0_16 = arith.constant 0 : index
      %c0_17 = arith.constant 0 : index
      %38 = vector.load %arg6[%c0_16, %c0_17] : memref<1x1xf32, #tpu.memory_space<vmem>>, vector<1x1xf32>
      %39 = vector.shape_cast %27 : vector<128x1xf32> to vector<1x128x1xf32>
      %cst_18 = arith.constant dense<0.000000e+00> : vector<1xf32>
      %40 = vector.multi_reduction <add>, %39, %cst_18 [1, 2] : vector<1x128x1xf32> to vector<1xf32>
      %41 = vector.shape_cast %40 : vector<1xf32> to vector<1x1x1xf32>
      %42 = vector.extract %41[0, 0, 0] : f32 from vector<1x1x1xf32>
      %43 = vector.broadcast %42 : f32 to vector<1x1xf32>
      %44 = arith.addf %38, %43 : vector<1x1xf32>
      %c0_19 = arith.constant 0 : index
      %c0_20 = arith.constant 0 : index
      %45 = vector.load %arg6[%c0_19, %c0_20] : memref<1x1xf32, #tpu.memory_space<vmem>>, vector<1x1xf32>
      tpu.vector_store %arg6[%c0_19, %c0_20], %44 {strides = array<i32>} : memref<1x1xf32, #tpu.memory_space<vmem>>, vector<1x1xf32>,
    } else {
    }
    %true = arith.constant true
    %32 = arith.xori %29, %true : i1
    %33 = arith.extui %32 : i1 to i32
    %c0_i32_13 = arith.constant 0 : i32
    %34 = arith.cmpi ne, %33, %c0_i32_13 : i32
    scf.if %34 {
      %38 = tpu.iota {dimensions = array<i32: 0>} : vector<128x1xi32>
      %39 = vector.broadcast %5 : i32 to vector<128x1xi32>
      %40 = arith.addi %39, %38 : vector<128x1xi32>
      %c0_16 = arith.constant 0 : index
      %c0_17 = arith.constant 0 : index
      %41 = vector.load %arg6[%c0_16, %c0_17] : memref<1x1xf32, #tpu.memory_space<vmem>>, vector<1x1xf32>
      %c8_i32_18 = arith.constant 8 : i32
      %42 = vector.broadcast %c8_i32_18 : i32 to vector<128x1xi32>
      %43 = arith.cmpi slt, %40, %42 : vector<128x1xi32>
      %cst_19 = arith.constant 0.000000e+00 : f32
      %44 = vector.broadcast %cst_19 : f32 to vector<128x1xf32>
      %45 = arith.select %43, %27, %44 : vector<128x1xi1>, vector<128x1xf32>
      %46 = vector.shape_cast %45 : vector<128x1xf32> to vector<1x128x1xf32>
      %cst_20 = arith.constant dense<0.000000e+00> : vector<1xf32>
      %47 = vector.multi_reduction <add>, %46, %cst_20 [1, 2] : vector<1x128x1xf32> to vector<1xf32>
      %48 = vector.shape_cast %47 : vector<1xf32> to vector<1x1x1xf32>
      %49 = vector.extract %48[0, 0, 0] : f32 from vector<1x1x1xf32>
      %50 = vector.broadcast %49 : f32 to vector<1x1xf32>
      %51 = arith.addf %41, %50 : vector<1x1xf32>
      %c0_21 = arith.constant 0 : index
      %c0_22 = arith.constant 0 : index
      %52 = vector.load %arg6[%c0_21, %c0_22] : memref<1x1xf32, #tpu.memory_space<vmem>>, vector<1x1xf32>
      tpu.vector_store %arg6[%c0_21, %c0_22], %51 {strides = array<i32>} : memref<1x1xf32, #tpu.memory_space<vmem>>, vector<1x1xf32>,
    } else {
    }
    %c0_i32_14 = arith.constant 0 : i32
    %35 = arith.cmpi eq, %arg1, %c0_i32_14 : i32
    %36 = arith.extui %35 : i1 to i32
    %c0_i32_15 = arith.constant 0 : i32
    %37 = arith.cmpi ne, %36, %c0_i32_15 : i32
    scf.if %37 {
      %c0_16 = arith.constant 0 : index
      %c0_17 = arith.constant 0 : index
      %38 = vector.load %arg6[%c0_16, %c0_17] : memref<1x1xf32, #tpu.memory_space<vmem>>, vector<1x1xf32>
      %cst_18 = arith.constant 1.250000e-01 : f32
      %39 = vector.broadcast %cst_18 : f32 to vector<1x1xf32>
      %40 = arith.mulf %38, %39 : vector<1x1xf32>
      %41 = vector.shape_cast %40 : vector<1x1xf32> to vector<1x1x1xf32>
      %42 = vector.shape_cast %41 : vector<1x1x1xf32> to vector<1x1x1xf32>
      %43 = vector.broadcast %42 : vector<1x1x1xf32> to vector<1x8x128xf32>
      %c0_19 = arith.constant 0 : index
      %c0_20 = arith.constant 0 : index
      %c0_21 = arith.constant 0 : index
      %44 = vector.load %arg5[%c0_19, %c0_20, %c0_21] : memref<1x8x128xf32, #tpu.memory_space<vmem>>, vector<1x8x128xf32>
      tpu.vector_store %arg5[%c0_19, %c0_20, %c0_21], %43 {strides = array<i32>} : memref<1x8x128xf32, #tpu.memory_space<vmem>>, vector<1x8x128xf32>,
    } else {
    }
    return
  }
  func.func @transform_0(%arg0: i32, %arg1: i32) -> (i32, i32) {
    %c1_i32 = arith.constant 1 : i32
    %0 = arith.muli %arg0, %c1_i32 : i32
    %1 = arith.addi %0, %arg1 : i32
    %c0_i32 = arith.constant 0 : i32
    %2 = arith.minsi %1, %c0_i32 : i32
    %c0_i32_0 = arith.constant 0 : i32
    %c0_i32_1 = arith.constant 0 : i32
    return %2, %c0_i32_0 : i32, i32
  }
  func.func @transform_1(%arg0: i32, %arg1: i32) -> (i32, i32) {
    %c1_i32 = arith.constant 1 : i32
    %0 = arith.muli %arg0, %c1_i32 : i32
    %1 = arith.addi %0, %arg1 : i32
    %c0_i32 = arith.constant 0 : i32
    %2 = arith.minsi %1, %c0_i32 : i32
    %c0_i32_0 = arith.constant 0 : i32
    %c0_i32_1 = arith.constant 0 : i32
    return %2, %c0_i32_0 : i32, i32
  }
  func.func @transform_2(%arg0: i32, %arg1: i32) -> (i32, i32) {
    %c1_i32 = arith.constant 1 : i32
    %0 = arith.muli %arg0, %c1_i32 : i32
    %1 = arith.addi %0, %arg1 : i32
    %c0_i32 = arith.constant 0 : i32
    %2 = arith.minsi %1, %c0_i32 : i32
    %c0_i32_0 = arith.constant 0 : i32
    %c0_i32_1 = arith.constant 0 : i32
    return %2, %c0_i32_0 : i32, i32
  }
  func.func @transform_3(%arg0: i32, %arg1: i32) -> (i32, i32, i32) {
    %c0_i32 = arith.constant 0 : i32
    %c0_i32_0 = arith.constant 0 : i32
    %c0_i32_1 = arith.constant 0 : i32
    return %arg0, %c0_i32, %c0_i32_0 : i32, i32, i32
  }
}

</mosaic_0001>

<bundles_post_ra>
// kernel: tpu_custom_call.1
= control target key start
LH: loop header
LB: loop body
LE: loop exit
PB: predicated region body
PF: predicated region fallthrough
CT: control target
= control target key end

     0   :  { %s817_s0 = inlined_call_operand.vmem [shape: f32[8,32], index: 0, kind: input, shape index: {}]   ;;  %s818_s1 = inlined_call_operand.vmem [shape: f32[8,32], index: 1, kind: input, shape index: {}]   ;;  %s819_s2 = inlined_call_operand.vmem [shape: f32[128,1], index: 2, kind: input, shape index: {}]   ;;  %s820_s3 = inlined_call_operand.hbm [shape: f32[1,8,128], index: 3, kind: output, shape index: {}]  }
   0x1   :  { %v139_v0 = vld [vmem:[%s817_s0] sm:$0xff] }
   0x2   :  { %v155_v1 = vld [vmem:[%s818_s1] sm:$0xff] }
   0x3   :  { %8 = vsyncpa [#allocation4], 0  ;;  %v187_v2 = vsub.f32 %v139_v0, %v155_v1  ;;  %vm235_vm0 = vcmask 261120   ;;  %v171_v13 = vld [vmem:[%s819_s2] sm:$0xff]  ;;  %vm646_vm3 = vcmask 7168   ;;  %vm135_vm4 = vcmask 0  }
   0x4   :  { %v412_v14 = vsub.f32 1.0, %v171_v13  ;;  %v771_v22 = vmov 0.0   ;;  %v772_v23 = vmov 0   ;;  %v697_v34 = vlaneseq  ;;  %s773_s2 = smov [#allocation3]  }
   0x5   :  { %v203_v3 = vadd.f32 1e-06, %v187_v2  ;;  %136 = vst.msk [vmem:[#allocation2] sm:$0x1] %vm135_vm4, %v771_v22  ;;  %743 = vset.pattern.permute.xlu1 %v772_v23  ;;  %744 = vset.pattern.permute.xlu0 %v772_v23  ;;  %s712_s17 = sshll.u32 %s773_s2, 4  ;;  %s713_s17 = int_to_ptr.vmem [resolvable:$true] %s712_s17 }
   0x6   :  { %v698_v35 = vshrl.u32 %v697_v34, 7  ;;  %s747_s18 = scalar_lea.vmem %s713_s17, 128  ;;  %p752_p1 = scmp.lt.s32.totalorder %s713_s17, %s713_s17 }
   0x7   :  { %v219_v4 = vmul.f32 %v203_v3, %v203_v3  ;;  %p748_p0 = scmp.ne.s32.totalorder %s713_s17, %s747_s18  ;;  %p753_p2 = scmp.lt.s32.totalorder %s747_s18, %s747_s18 }
   0x8   :  { %v699_v36 = vsub.s32 0, %v698_v35 }
   0x9   :  { %v236_v5 = vsel %vm235_vm0, %v219_v4, 0.0  ;;  %p754_p3 = por %p753_p2, %p752_p1 }
   0xa   :  { %237 = vadd.xlane.f32.xlu0 %v236_v5 }
   0xb   :  { %p755_p4 = pnand %p754_p3, %p748_p0 }
   0xc   :  { %v613_v31 = vld [vmem:[#allocation2] sm:$0x1] }
  0x97   :  { %v238_v6 = vpop.xlane.xlu0 %237 }
  0x98   :  { %745 = vrsqrt.f32 %v238_v6  ;;  %vm286_vm1 = vcmp.eq.f32.partialorder %v238_v6, inf  ;;  %v289_v9 = vand.u32 2147483648, %v238_v6  ;;  %vm288_vm2 = vcmp.eq.f32.partialorder %v238_v6, 0.0 }
  0x99   :  { %v396_v17 = vmul.f32 %v238_v6, %v171_v13 }
  0xa2   :  { %v746_v7 = vpop.eup %745 }
  0xa3   :  { %v285_v8 = vmul.f32 %v746_v7, %v238_v6 }
  0xa5   :  { %v287_v10 = vsel %vm286_vm1, %v238_v6, %v285_v8 }
  0xa6   :  { %v290_v11 = vsel %vm288_vm2, %v289_v9, %v287_v10 }
  0xa7   :  { %v428_v12 = vsub.f32 0.5, %v290_v11 }
  0xa9   :  { %v444_v15 = vmax.f32 %v428_v12, 0.0 }
  0xab   :  { %v460_v16 = vmul.f32 %v444_v15, %v444_v15 }
  0xad   :  { %v476_v18 = vmul.f32 %v460_v16, %v412_v14 }
  0xaf   :  { %v492_v19 = vadd.f32 %v476_v18, %v396_v17 }
  0xb1   :  { %v508_v20 = vmul.f32 0.5, %v492_v19 }
  0xb3   :  { %v647_v21 = vsel %vm646_vm3, %v508_v20, 0.0 }
  0xb4   :  { %678 = vadd.xlane.f32.xlu0 %v647_v21 }
 0x141   :  { %v679_v24 = vpop.xlane.xlu0 %678 }
 0x142   :  { %v680_v25 = vrot.slane %v679_v24, 4 }
 0x144   :  { %v681_v26 = vadd.f32 %v680_v25, %v679_v24 }
 0x146   :  { %v682_v27 = vrot.slane %v681_v26, 2 }
 0x148   :  { %v683_v28 = vadd.f32 %v682_v27, %v681_v26 }
 0x14a   :  { %v684_v29 = vrot.slane %v683_v28, 1 }
 0x14c   :  { %v685_v30 = vadd.f32 %v684_v29, %v683_v28 }
 0x14e   :  { %738 = vpush %v685_v30 }
 0x17f   :  { %s739_s1 = spop %738 }
 0x180   :  { %v687_v32 = vstv %s739_s1 }
 0x181   :  { %v688_v33 = vadd.f32 %v687_v32, %v613_v31 }
 0x183   :  { %690 = vst.msk [vmem:[#allocation2] sm:$0x1] %vm135_vm4, %v688_v33 }
 0x18a   :  { %v694_v37 = vld [vmem:[#allocation2] sm:$0x1] }
 0x18b   :  { %v695_v38 = vmul.f32 0.125, %v694_v37 }
 0x18d   :  { %v700_v39 = vrot.slane %v695_v38, %v699_v36 }
 0x18f   :  { %702 = vperm.xlu1 %743, %v700_v39  }
 0x20e   :  { %v703_v40 = vpop.permute.xlu1 %702 }
 0x20f   :  { %705 = vst [vmem:[#allocation3] sm:$0xff] %v703_v40 }
 0x210   :  { %758 = shalt.err (!%p755_p4)
}
 0x211   :  { %s759_s21 = scalar_lea.hbm %s820_s3, 128 }
 0x212   :  { %p760_p5 = scmp.ne.s32.totalorder %s820_s3, %s759_s21  ;;  %p763_p6 = scmp.lt.u32.totalorder %s759_s21, %s820_s3 }
 0x214   :  { %p765_p7 = pnand %p763_p6, %p760_p5 }
 0x216   :  { %768 = shalt.err (!%p765_p7)
}
 0x217   :  { %715 = dma.vmem_to_hbm [thread:$0]  %s713_s17, 128, %s820_s3, [#allocation4]  }
 0x218   :  { %769 = dma.done.wait [#allocation4], 128  }
 0x219   :  { %770 = vsyncadd [#allocation4], 4294967168 }
 0x21a   :  { %719 = vsyncpa [#allocation4], 1 }

</bundles_post_ra>
